<compile_context>
chip_gen: v6e
topology: v6e:2x2x1
jax: 0.10.0
libtpu: 0.0.40
codegen_flags: <defaults>
</compile_context>

<pallas_src>
import jax
import jax.numpy as jnp
from jax.experimental import pallas as pl
from jax.experimental.pallas import tpu as pltpu


LANES = 128              # TPU vreg lane width
PALLAS_MIN_ROWS = 4096   # below this the op is pure dispatch overhead -> plain XLA
MIN_TILE = 512           # packed rows per block before we bother splitting (~256 KiB/buf)
MAX_TILE = 4096          # packed rows per block (~2 MiB/buf) -> ~8 MiB double-buffered, v7x-safe


def _round_up(n, m):
    return ((n + m - 1) // m) * m


def _packed_linear_relu_kernel(x_ref, w_ref, b_ref, o_ref):
    # x_ref: (TILE, 128)   w_ref: (128, 128) block-diagonal (8x W^T)
    # b_ref: (1, 128)      o_ref: (TILE, 128)
    y = jnp.dot(x_ref[...], w_ref[...], preferred_element_type=jnp.float32)
    o_ref[...] = jnp.maximum(y + b_ref[...], 0.0).astype(o_ref.dtype)


def linear_add_relu(x, weight, bias, other, *, force_pallas=False):
    """relu(x @ weight.T + bias + other). weight: PyTorch (OUT, IN) layout; other: scalar."""
    B, IN = x.shape
    OUT = weight.shape[0]

    # `other` is a true scalar in the reference module; fold it into the bias once.
    # TODO(synk): if `other` were a per-example (B, OUT) tensor it must become a
    # tiled kernel operand instead of being folded here.
    b_fused = bias + jnp.asarray(other, dtype=bias.dtype)

    packable = (LANES % IN == 0) and (IN == OUT)
    if (B < PALLAS_MIN_ROWS and not force_pallas) or not packable:
        # Tiny batch (the module's actual B=1): custom-call dispatch, DMA setup and
        # grid prologue dominate -> let XLA fuse this into one tiny kernel.
        return jnp.maximum(x @ weight.T + b_fused, 0.0)

    # ---- lane-dense packing: `pack` original rows -> one 128-lane packed row ----
    pack = LANES // IN           # 8 for IN=16
    pw = pack * IN               # 128 (== pack * OUT since IN == OUT)

    b8 = _round_up(B, pack)
    x8 = x if b8 == B else jnp.pad(x, ((0, b8 - B), (0, 0)))   # at most `pack-1` pad rows
    n_packed = b8 // pack
    xp = x8.reshape(n_packed, pw)                               # free row-major view

    # Block-diagonal weight: 8 copies of W^T on the diagonal -> (128, 128).
    w_block = jnp.kron(jnp.eye(pack, dtype=weight.dtype), weight.T)
    b_block = jnp.tile(b_fused, pack).reshape(1, pw)

    if n_packed <= MIN_TILE:
        tile = n_packed              # single full-array block (always layout-legal)
    else:
        # >=2 blocks so both v7x TensorCores get work; blocks as big as VMEM allows.
        tile = min(MAX_TILE, _round_up(pl.cdiv(n_packed, 2), 8))
    grid = (pl.cdiv(n_packed, tile),)   # ragged last block handled by Pallas masking

    flops = 2 * n_packed * pw * pw
    bytes_accessed = 4 * (n_packed * 2 * pw + pw * pw + pw)

    out_p = pl.pallas_call(
        _packed_linear_relu_kernel,
        out_shape=jax.ShapeDtypeStruct((n_packed, pw), x.dtype),
        grid=grid,
        in_specs=[
            pl.BlockSpec((tile, pw), lambda i: (i, 0)),   # packed x rows, tiled over batch
            pl.BlockSpec((pw, pw), lambda i: (0, 0)),     # block-diag weight, VMEM-resident
            pl.BlockSpec((1, pw), lambda i: (0, 0)),      # fused + tiled bias, VMEM-resident
        ],
        out_specs=pl.BlockSpec((tile, pw), lambda i: (i, 0)),
        compiler_params=pltpu.CompilerParams(
            dimension_semantics=("parallel",),            # shard batch across TCs on v7x
        ),
        cost_estimate=pl.CostEstimate(
            flops=flops, transcendentals=0, bytes_accessed=bytes_accessed),
    )(xp, w_block, b_block)

    out = out_p.reshape(b8, OUT)                          # free row-major view back
    return out if b8 == B else out[:B]


if __name__ == "__main__":
    key = jax.random.PRNGKey(0)
    k_x, k_w, k_b, k_x2, k_x3 = jax.random.split(key, 5)

    IN, OUT = 16, 16
    bound = 1.0 / (IN ** 0.5)
    weight = jax.random.uniform(k_w, (OUT, IN), jnp.float32, -bound, bound)
    bias = jax.random.uniform(k_b, (OUT,), jnp.float32, -bound, bound)
    other = 1.0

    def ref_fn(xx):
        return jnp.maximum(xx @ weight.T + bias + other, 0.0)

    # Module's actual shape: x = torch.randn(1, 16).  Tiny batch -> fused XLA path.
    x1 = jax.random.normal(k_x, (1, IN), dtype=jnp.float32)
    o1 = linear_add_relu(x1, weight, bias, other)
    jax.block_until_ready(o1)
    assert jnp.allclose(o1, ref_fn(x1), atol=1e-5, rtol=1e-5), "mismatch (B=1)"

    # Exercise the lane-dense Pallas kernel (multiple-of-8 batch).
    x2 = jax.random.normal(k_x2, (1024, IN), dtype=jnp.float32)
    o2 = linear_add_relu(x2, weight, bias, other, force_pallas=True)
    jax.block_until_ready(o2)
    assert jnp.allclose(o2, ref_fn(x2), atol=1e-5, rtol=1e-5), "mismatch (B=1024)"

    # Ragged batch (not a multiple of 8) through the Pallas path.
    x3 = jax.random.normal(k_x3, (1037, IN), dtype=jnp.float32)
    o3 = linear_add_relu(x3, weight, bias, other, force_pallas=True)
    jax.block_until_ready(o3)
    assert jnp.allclose(o3, ref_fn(x3), atol=1e-5, rtol=1e-5), "mismatch (B=1037)"

    print("KERNEL_OK")
</pallas_src>

<mosaic_0001>
module attributes {stable_mosaic.version = 11 : i64} {
  func.func @_packed_linear_relu_kernel(%arg0: i32, %arg1: memref<128x128xf32, #tpu.memory_space<vmem>>, %arg2: memref<128x128xf32, #tpu.memory_space<vmem>>, %arg3: memref<1x128xf32, #tpu.memory_space<vmem>>, %arg4: memref<128x128xf32, #tpu.memory_space<vmem>>) attributes {dimension_semantics = [#tpu.dimension_semantics<parallel>], iteration_bounds = array<i64: 1>, scalar_prefetch = 0 : i64, scratch_operands = 0 : i64, tpu.core_type = #tpu.core_type<tc>, window_params = [{transform_indices = @transform_0, window_bounds = array<i64: 128, 128>}, {pipeline_mode = #tpu.pipeline_mode<synchronous>, transform_indices = @transform_1, window_bounds = array<i64: 128, 128>}, {pipeline_mode = #tpu.pipeline_mode<synchronous>, transform_indices = @transform_2, window_bounds = array<i64: 1, 128>}, {transform_indices = @transform_3, window_bounds = array<i64: 128, 128>}]} {
    %c0 = arith.constant 0 : index
    %c0_0 = arith.constant 0 : index
    %0 = vector.load %arg1[%c0, %c0_0] : memref<128x128xf32, #tpu.memory_space<vmem>>, vector<128x128xf32>
    %c0_1 = arith.constant 0 : index
    %c0_2 = arith.constant 0 : index
    %1 = vector.load %arg2[%c0_1, %c0_2] : memref<128x128xf32, #tpu.memory_space<vmem>>, vector<128x128xf32>
    %cst = arith.constant dense<0.000000e+00> : vector<128x128xf32>
    %2 = tpu.matmul %0, %1, %cst {dimension_numbers = #tpu.dot_dimension_numbers<[1], [0], [0], [1], [0, 0, 1, 1], [], []>} : vector<128x128xf32>, vector<128x128xf32>, vector<128x128xf32> -> vector<128x128xf32>
    %c0_3 = arith.constant 0 : index
    %c0_4 = arith.constant 0 : index
    %3 = vector.load %arg3[%c0_3, %c0_4] : memref<1x128xf32, #tpu.memory_space<vmem>>, vector<1x128xf32>
    %4 = vector.broadcast %3 : vector<1x128xf32> to vector<128x128xf32>
    %5 = arith.addf %2, %4 : vector<128x128xf32>
    %cst_5 = arith.constant 0.000000e+00 : f32
    %6 = vector.broadcast %cst_5 : f32 to vector<128x128xf32>
    %7 = arith.maximumf %5, %6 : vector<128x128xf32>
    %c0_6 = arith.constant 0 : index
    %c0_7 = arith.constant 0 : index
    %8 = vector.load %arg4[%c0_6, %c0_7] : memref<128x128xf32, #tpu.memory_space<vmem>>, vector<128x128xf32>
    tpu.vector_store %arg4[%c0_6, %c0_7], %7 {strides = array<i32>} : memref<128x128xf32, #tpu.memory_space<vmem>>, vector<128x128xf32>,
    return
  }
  func.func @transform_0(%arg0: i32) -> (i32, i32) {
    %c0_i32 = arith.constant 0 : i32
    %c0_i32_0 = arith.constant 0 : i32
    return %arg0, %c0_i32 : i32, i32
  }
  func.func @transform_1(%arg0: i32) -> (i32, i32) {
    %c0_i32 = arith.constant 0 : i32
    %c0_i32_0 = arith.constant 0 : i32
    %c0_i32_1 = arith.constant 0 : i32
    return %c0_i32, %c0_i32_0 : i32, i32
  }
  func.func @transform_2(%arg0: i32) -> (i32, i32) {
    %c0_i32 = arith.constant 0 : i32
    %c0_i32_0 = arith.constant 0 : i32
    %c0_i32_1 = arith.constant 0 : i32
    return %c0_i32, %c0_i32_0 : i32, i32
  }
  func.func @transform_3(%arg0: i32) -> (i32, i32) {
    %c0_i32 = arith.constant 0 : i32
    %c0_i32_0 = arith.constant 0 : i32
    return %arg0, %c0_i32 : i32, i32
  }
}

</mosaic_0001>

<bundles_post_ra>
// kernel: tpu_custom_call.1
= control target key start
LH: loop header
LB: loop body
LE: loop exit
PB: predicated region body
PF: predicated region fallthrough
CT: control target
= control target key end

     0   :  { %8 = vsyncpa [#allocation3], 0  ;;  %s515_s0 = inlined_call_operand.hbm [shape: f32[128,128], index: 0, kind: input, shape index: {}]   ;;  %s516_s1 = inlined_call_operand.hbm [shape: f32[128,128], index: 1, kind: input, shape index: {}]   ;;  %s517_s2 = inlined_call_operand.vmem [shape: f32[1,128], index: 2, kind: input, shape index: {}]   ;;  %s518_s3 = inlined_call_operand.hbm [shape: f32[128,128], index: 3, kind: output, shape index: {}]  }
   0x1   :  { %9 = vsyncpa [#allocation6], 0 }
   0x2   :  { %10 = vsyncpa [#allocation4], 0  ;;  %s469_s12 = smov [#allocation2]  }
   0x3   :  { %s16_s13 = sshll.u32 %s469_s12, 4  ;;  %s17_s13 = int_to_ptr.vmem [resolvable:$true] %s16_s13 }
   0x4   :  { %s411_s14 = scalar_lea.vmem %s17_s13, 2048  ;;  %p416_p1 = scmp.lt.s32.totalorder %s17_s13, %s17_s13 }
   0x5   :  { %p412_p0 = scmp.ne.s32.totalorder %s17_s13, %s411_s14  ;;  %p417_p2 = scmp.lt.s32.totalorder %s411_s14, %s411_s14 }
   0x7   :  { %p418_p3 = por %p417_p2, %p416_p1 }
   0x9   :  { %p419_p4 = pnand %p418_p3, %p412_p0 }
   0xb   :  { %422 = shalt.err (!%p419_p4)
}
   0xc   :  { %s470_s15 = smov 128   ;;  %s471_s16 = smov 8  }
   0xd   :  { %22 = dma.hbm_to_vmem [thread:$0]  %s515_s0, 2048, %s17_s13, [#allocation3], %s470_s15, %s470_s15, %s471_s16  }
   0xe   :  { %s472_s19 = smov [#allocation5]  }
   0xf   :  { %s28_s20 = sshll.u32 %s472_s19, 4  ;;  %s29_s20 = int_to_ptr.vmem [resolvable:$true] %s28_s20 }
  0x10   :  { %s431_s21 = scalar_lea.vmem %s29_s20, 2048  ;;  %p436_p6 = scmp.lt.s32.totalorder %s29_s20, %s29_s20 }
  0x11   :  { %p432_p5 = scmp.ne.s32.totalorder %s29_s20, %s431_s21  ;;  %p437_p7 = scmp.lt.s32.totalorder %s431_s21, %s431_s21 }
  0x13   :  { %p438_p8 = por %p437_p7, %p436_p6 }
  0x15   :  { %p439_p9 = pnand %p438_p8, %p432_p5 }
  0x17   :  { %442 = shalt.err (!%p439_p9)
}
  0x18   :  { %34 = dma.hbm_to_vmem [thread:$0]  %s516_s1, 2048, %s29_s20, [#allocation6], %s470_s15, %s470_s15, %s471_s16  }
  0x19   :  { %463 = dma.done.wait [#allocation3], 2048  }
  0x1a   :  { %464 = vsyncadd [#allocation3], 4294965248 }
  0x1b   :  { %465 = dma.done.wait [#allocation6], 2048  }
  0x1c   :  { %466 = vsyncadd [#allocation6], 4294965248  ;;  %v74_v0 = vld [vmem:[#allocation5 + $0x78] sm:$0xff]  ;;  %v73_v1 = vld [vmem:[#allocation5 + $0x70] sm:$0xff] }
  0x1d   :  { %310 = vmatprep.subr.mxu0 %v74_v0  ;;  %366 = vmatprep.subr.mxu1 %v74_v0  ;;  %v72_v2 = vld [vmem:[#allocation5 + $0x68] sm:$0xff]  ;;  %v71_v3 = vld [vmem:[#allocation5 + $0x60] sm:$0xff]  ;;  %v70_v4 = vld [vmem:[#allocation5 + $0x58] sm:$0xff] }
  0x1e   :  { %311 = vmatpush3.msra.mxu0 %v74_v0  ;;  %382 = vmatpush3.msra.mxu1 %v74_v0  ;;  %v69_v5 = vld [vmem:[#allocation5 + $0x50] sm:$0xff]  ;;  %v68_v6 = vld [vmem:[#allocation5 + $0x48] sm:$0xff]  ;;  %v67_v7 = vld [vmem:[#allocation5 + $0x40] sm:$0xff] }
  0x1f   :  { %312 = vmatprep.subr.mxu0 %v73_v1  ;;  %367 = vmatprep.subr.mxu1 %v73_v1  ;;  %v66_v8 = vld [vmem:[#allocation5 + $0x38] sm:$0xff]  ;;  %v65_v9 = vld [vmem:[#allocation5 + $0x30] sm:$0xff]  ;;  %v64_v10 = vld [vmem:[#allocation5 + $0x28] sm:$0xff] }
  0x20   :  { %313 = vmatpush3.msra.mxu0 %v73_v1  ;;  %383 = vmatpush3.msra.mxu1 %v73_v1  ;;  %v63_v11 = vld [vmem:[#allocation5 + $0x20] sm:$0xff]  ;;  %v62_v12 = vld [vmem:[#allocation5 + $0x18] sm:$0xff]  ;;  %v61_v13 = vld [vmem:[#allocation5 + $0x10] sm:$0xff] }
  0x21   :  { %314 = vmatprep.subr.mxu0 %v72_v2  ;;  %368 = vmatprep.subr.mxu1 %v72_v2  ;;  %v60_v14 = vld [vmem:[#allocation5 + $0x8] sm:$0xff]  ;;  %v59_v15 = vld [vmem:[#allocation5] sm:$0xff]  ;;  %v45_v20 = vld [vmem:[#allocation2 + $0x10] sm:$0xff] }
  0x22   :  { %315 = vmatpush3.msra.mxu0 %v72_v2  ;;  %384 = vmatpush3.msra.mxu1 %v72_v2  ;;  %v43_v16 = vld [vmem:[#allocation2] sm:$0xff]  ;;  %v44_v18 = vld [vmem:[#allocation2 + $0x8] sm:$0xff]  ;;  %v53_v21 = vld [vmem:[#allocation2 + $0x50] sm:$0xff] }
  0x23   :  { %316 = vmatprep.subr.mxu0 %v71_v3  ;;  %369 = vmatprep.subr.mxu1 %v71_v3  ;;  %v51_v17 = vld [vmem:[#allocation2 + $0x40] sm:$0xff]  ;;  %v52_v19 = vld [vmem:[#allocation2 + $0x48] sm:$0xff]  ;;  %v46_v22 = vld [vmem:[#allocation2 + $0x18] sm:$0xff] }
  0x24   :  { %317 = vmatpush3.msra.mxu0 %v71_v3  ;;  %385 = vmatpush3.msra.mxu1 %v71_v3  ;;  %v54_v23 = vld [vmem:[#allocation2 + $0x58] sm:$0xff]  ;;  %v47_v24 = vld [vmem:[#allocation2 + $0x20] sm:$0xff]  ;;  %v48_v26 = vld [vmem:[#allocation2 + $0x28] sm:$0xff] }
  0x25   :  { %318 = vmatprep.subr.mxu0 %v70_v4  ;;  %370 = vmatprep.subr.mxu1 %v70_v4  ;;  %v55_v25 = vld [vmem:[#allocation2 + $0x60] sm:$0xff]  ;;  %v56_v27 = vld [vmem:[#allocation2 + $0x68] sm:$0xff]  ;;  %v49_v28 = vld [vmem:[#allocation2 + $0x30] sm:$0xff] }
  0x26   :  { %319 = vmatpush3.msra.mxu0 %v70_v4  ;;  %386 = vmatpush3.msra.mxu1 %v70_v4  ;;  %v57_v29 = vld [vmem:[#allocation2 + $0x70] sm:$0xff]  ;;  %v50_v30 = vld [vmem:[#allocation2 + $0x38] sm:$0xff]  ;;  %v277_v32 = vld [vmem:[%s517_s2] ss:$0 sm:$0xff]  ;;  %s473_s2 = smov [#allocation7]  }
  0x27   :  { %320 = vmatprep.subr.mxu0 %v69_v5  ;;  %371 = vmatprep.subr.mxu1 %v69_v5  ;;  %v58_v31 = vld [vmem:[#allocation2 + $0x78] sm:$0xff]  ;;  %s264_s24 = sshll.u32 %s473_s2, 4  ;;  %s265_s24 = int_to_ptr.vmem [resolvable:$true] %s264_s24 }
  0x28   :  { %321 = vmatpush3.msra.mxu0 %v69_v5  ;;  %387 = vmatpush3.msra.mxu1 %v69_v5  ;;  %s443_s25 = scalar_lea.vmem %s265_s24, 2048  ;;  %p448_p11 = scmp.lt.s32.totalorder %s265_s24, %s265_s24 }
  0x29   :  { %322 = vmatprep.subr.mxu0 %v68_v6  ;;  %372 = vmatprep.subr.mxu1 %v68_v6  ;;  %p444_p10 = scmp.ne.s32.totalorder %s265_s24, %s443_s25  ;;  %p449_p12 = scmp.lt.s32.totalorder %s443_s25, %s443_s25 }
  0x2a   :  { %323 = vmatpush3.msra.mxu0 %v68_v6  ;;  %388 = vmatpush3.msra.mxu1 %v68_v6 }
  0x2b   :  { %324 = vmatprep.subr.mxu0 %v67_v7  ;;  %373 = vmatprep.subr.mxu1 %v67_v7  ;;  %p450_p13 = por %p449_p12, %p448_p11 }
  0x2c   :  { %325 = vmatpush3.msra.mxu0 %v67_v7  ;;  %389 = vmatpush3.msra.mxu1 %v67_v7 }
  0x2d   :  { %326 = vmatprep.subr.mxu0 %v66_v8  ;;  %374 = vmatprep.subr.mxu1 %v66_v8  ;;  %p451_p0 = pnand %p450_p13, %p444_p10 }
  0x2e   :  { %327 = vmatpush3.msra.mxu0 %v66_v8  ;;  %390 = vmatpush3.msra.mxu1 %v66_v8 }
  0x2f   :  { %328 = vmatprep.subr.mxu0 %v65_v9  ;;  %375 = vmatprep.subr.mxu1 %v65_v9 }
  0x30   :  { %329 = vmatpush3.msra.mxu0 %v65_v9  ;;  %391 = vmatpush3.msra.mxu1 %v65_v9 }
  0x31   :  { %330 = vmatprep.subr.mxu0 %v64_v10  ;;  %376 = vmatprep.subr.mxu1 %v64_v10 }
  0x32   :  { %331 = vmatpush3.msra.mxu0 %v64_v10  ;;  %392 = vmatpush3.msra.mxu1 %v64_v10 }
  0x33   :  { %332 = vmatprep.subr.mxu0 %v63_v11  ;;  %377 = vmatprep.subr.mxu1 %v63_v11 }
  0x34   :  { %333 = vmatpush3.msra.mxu0 %v63_v11  ;;  %393 = vmatpush3.msra.mxu1 %v63_v11 }
  0x35   :  { %334 = vmatprep.subr.mxu0 %v62_v12  ;;  %378 = vmatprep.subr.mxu1 %v62_v12 }
  0x36   :  { %335 = vmatpush3.msra.mxu0 %v62_v12  ;;  %394 = vmatpush3.msra.mxu1 %v62_v12 }
  0x37   :  { %336 = vmatprep.subr.mxu0 %v61_v13  ;;  %379 = vmatprep.subr.mxu1 %v61_v13 }
  0x38   :  { %337 = vmatpush3.msra.mxu0 %v61_v13  ;;  %395 = vmatpush3.msra.mxu1 %v61_v13 }
  0x39   :  { %338 = vmatprep.subr.mxu0 %v60_v14  ;;  %380 = vmatprep.subr.mxu1 %v60_v14 }
  0x3a   :  { %339 = vmatpush3.msra.mxu0 %v60_v14  ;;  %396 = vmatpush3.msra.mxu1 %v60_v14 }
  0x3b   :  { %340 = vmatprep.subr.mxu0 %v59_v15  ;;  %381 = vmatprep.subr.mxu1 %v59_v15 }
  0x3c   :  { %341 = vmatpush3.msra.mxu0 %v59_v15  ;;  %397 = vmatpush3.msra.mxu1 %v59_v15 }
  0x3d   :  { %342 = vmatprep.mubr.f32.mxu0 %v43_v16  ;;  %354 = vmatprep.mubr.f32.mxu1 %v51_v17 }
  0x3e   :  { %343 = vmatmul.mubr.f32.vlgmr.msra.gmra.mxu0 %v44_v18  ;;  %355 = vmatmul.mubr.f32.vlgmr.msra.gmra.mxu1 %v52_v19 }
  0x3f   :  { %345 = vmatprep.mubr.f32.mxu0 %v45_v20  ;;  %357 = vmatprep.mubr.f32.mxu1 %v53_v21 }
  0x42   :  { %346 = vmatmul.mubr.f32.gmra.mxu0 %v46_v22  ;;  %358 = vmatmul.mubr.f32.gmra.mxu1 %v54_v23 }
  0x43   :  { %348 = vmatprep.mubr.f32.mxu0 %v47_v24  ;;  %360 = vmatprep.mubr.f32.mxu1 %v55_v25 }
  0x46   :  { %349 = vmatmul.mubr.f32.gmra.mxu0 %v48_v26  ;;  %361 = vmatmul.mubr.f32.gmra.mxu1 %v56_v27 }
  0x47   :  { %351 = vmatprep.mubr.f32.mxu0 %v49_v28  ;;  %363 = vmatprep.mubr.f32.mxu1 %v57_v29 }
  0x4a   :  { %352 = vmatmul.mubr.f32.gmra.mxu0 %v50_v30  ;;  %364 = vmatmul.mubr.f32.gmra.mxu1 %v58_v31 }
  0xfe   :  { %v344_v33 = vpop.f32.mrf.mxu0  ;;  %v356_v34 = vpop.f32.mrf.mxu1 }
  0xff   :  { %v154_v35 = vadd.f32 %v344_v33, %v277_v32  ;;  %v194_v36 = vadd.f32 %v356_v34, %v277_v32 }
 0x100   :  { %v148_v37 = vpop.f32.mrf.mxu0  ;;  %v188_v38 = vpop.f32.mrf.mxu1 }
 0x101   :  { %v228_v39 = vmax.f32 %v154_v35, 0.0  ;;  %v236_v40 = vmax.f32 %v194_v36, 0.0  ;;  %v149_v41 = vadd.f32 %v277_v32, %v148_v37  ;;  %v189_v42 = vadd.f32 %v277_v32, %v188_v38 }
 0x102   :  { %v347_v43 = vpop.f32.mrf.mxu0  ;;  %v359_v44 = vpop.f32.mrf.mxu1 }
 0x103   :  { %244 = vst [vmem:[#allocation7 + $0x8] sm:$0xff] %v228_v39  ;;  %252 = vst [vmem:[#allocation7 + $0x48] sm:$0xff] %v236_v40  ;;  %v227_v45 = vmax.f32 %v149_v41, 0.0  ;;  %v235_v46 = vmax.f32 %v189_v42, 0.0  ;;  %v164_v47 = vadd.f32 %v347_v43, %v277_v32  ;;  %v204_v48 = vadd.f32 %v359_v44, %v277_v32 }
 0x104   :  { %v158_v49 = vpop.f32.mrf.mxu0  ;;  %v198_v50 = vpop.f32.mrf.mxu1 }
 0x105   :  { %243 = vst [vmem:[#allocation7] sm:$0xff] %v227_v45  ;;  %251 = vst [vmem:[#allocation7 + $0x40] sm:$0xff] %v235_v46  ;;  %v230_v51 = vmax.f32 %v164_v47, 0.0  ;;  %v238_v52 = vmax.f32 %v204_v48, 0.0  ;;  %v159_v53 = vadd.f32 %v277_v32, %v158_v49  ;;  %v199_v54 = vadd.f32 %v277_v32, %v198_v50 }
 0x106   :  { %v350_v55 = vpop.f32.mrf.mxu0  ;;  %v362_v56 = vpop.f32.mrf.mxu1 }
 0x107   :  { %246 = vst [vmem:[#allocation7 + $0x18] sm:$0xff] %v230_v51  ;;  %254 = vst [vmem:[#allocation7 + $0x58] sm:$0xff] %v238_v52  ;;  %v229_v57 = vmax.f32 %v159_v53, 0.0  ;;  %v237_v58 = vmax.f32 %v199_v54, 0.0  ;;  %v174_v59 = vadd.f32 %v350_v55, %v277_v32  ;;  %v214_v60 = vadd.f32 %v362_v56, %v277_v32 }
 0x108   :  { %v168_v61 = vpop.f32.mrf.mxu0  ;;  %v208_v62 = vpop.f32.mrf.mxu1 }
 0x109   :  { %245 = vst [vmem:[#allocation7 + $0x10] sm:$0xff] %v229_v57  ;;  %253 = vst [vmem:[#allocation7 + $0x50] sm:$0xff] %v237_v58  ;;  %v232_v63 = vmax.f32 %v174_v59, 0.0  ;;  %v240_v0 = vmax.f32 %v214_v60, 0.0  ;;  %v169_v1 = vadd.f32 %v277_v32, %v168_v61  ;;  %v209_v2 = vadd.f32 %v277_v32, %v208_v62 }
 0x10a   :  { %v353_v3 = vpop.f32.mrf.mxu0  ;;  %v365_v4 = vpop.f32.mrf.mxu1 }
 0x10b   :  { %248 = vst [vmem:[#allocation7 + $0x28] sm:$0xff] %v232_v63  ;;  %256 = vst [vmem:[#allocation7 + $0x68] sm:$0xff] %v240_v0  ;;  %v231_v5 = vmax.f32 %v169_v1, 0.0  ;;  %v239_v6 = vmax.f32 %v209_v2, 0.0  ;;  %v184_v7 = vadd.f32 %v353_v3, %v277_v32  ;;  %v224_v8 = vadd.f32 %v365_v4, %v277_v32 }
 0x10c   :  { %v178_v9 = vpop.f32.mrf.mxu0  ;;  %v218_v10 = vpop.f32.mrf.mxu1 }
 0x10d   :  { %247 = vst [vmem:[#allocation7 + $0x20] sm:$0xff] %v231_v5  ;;  %255 = vst [vmem:[#allocation7 + $0x60] sm:$0xff] %v239_v6  ;;  %v234_v11 = vmax.f32 %v184_v7, 0.0  ;;  %v242_v12 = vmax.f32 %v224_v8, 0.0  ;;  %v179_v13 = vadd.f32 %v277_v32, %v178_v9  ;;  %v219_v14 = vadd.f32 %v277_v32, %v218_v10 }
 0x10f   :  { %250 = vst [vmem:[#allocation7 + $0x38] sm:$0xff] %v234_v11  ;;  %258 = vst [vmem:[#allocation7 + $0x78] sm:$0xff] %v242_v12  ;;  %v233_v15 = vmax.f32 %v179_v13, 0.0  ;;  %v241_v16 = vmax.f32 %v219_v14, 0.0 }
 0x111   :  { %249 = vst [vmem:[#allocation7 + $0x30] sm:$0xff] %v233_v15  ;;  %257 = vst [vmem:[#allocation7 + $0x70] sm:$0xff] %v241_v16 }
 0x112   :  { %454 = shalt.err (!%p451_p0)
}
 0x113   :  { %270 = dma.vmem_to_hbm [thread:$0]  %s265_s24, 2048, %s518_s3, [#allocation4], %s470_s15, %s470_s15, %s471_s16  }
 0x114   :  { %467 = dma.done.wait [#allocation4], 2048  }
 0x115   :  { %468 = vsyncadd [#allocation4], 4294965248 }
 0x116   :  { %274 = vsyncpa [#allocation3], 1 }
 0x117   :  { %275 = vsyncpa [#allocation6], 1 }
 0x118   :  { %276 = vsyncpa [#allocation4], 1 }

</bundles_post_ra>
